<compile_context>
chip_gen: v7x
topology: tpu7x:2x2x1
jax: 0.10.0
libtpu: 0.0.40
codegen_flags: <defaults>
</compile_context>

<pallas_src>
import numpy as np

import jax
import jax.numpy as jnp
from jax.experimental import pallas as pl
from jax.experimental.pallas import tpu as pltpu


def _toy_sae_kernel(h_ref, wenc_ref, wdec_ref, benc_ref, bdec_ref,
                    sel_rec_ref, sel_sp_ref,
                    acts_ref, hrec_ref, loss_ref):
    """One batch tile; all instances folded into block-diagonal matmuls."""
    op_dtype = wenc_ref.dtype  # matmul operand dtype == storage dtype

    # Element-wise work in f32 (v5e has no bf16 VPU); no-op for f32 inputs.
    h_f32 = h_ref[...].astype(jnp.float32)                       # (Bt, I*d_in)
    b_dec = bdec_ref[...].astype(jnp.float32)                    # (1,  I*d_in)
    h_cent = h_f32 - b_dec

    # Encoder: block-diagonal weights -> per-instance matmul, f32 accumulate.
    acts = jnp.maximum(
        jnp.dot(h_cent.astype(op_dtype), wenc_ref[...],
                preferred_element_type=jnp.float32)
        + benc_ref[...].astype(jnp.float32),
        0.0)                                                     # (Bt, I*d_sae) f32

    # Decoder (weights pre-normalized in the wrapper).
    hrec = jnp.dot(acts.astype(op_dtype), wdec_ref[...],
                   preferred_element_type=jnp.float32) + b_dec   # (Bt, I*d_in) f32

    # Store directly (one lane-dense store per output; no list/concat of
    # per-instance columns).
    acts_ref[...] = acts.astype(acts_ref.dtype)
    hrec_ref[...] = hrec.astype(hrec_ref.dtype)

    # Per-instance reductions as small selector matmuls on the MXU
    # (sel_rec carries the 1/d_in so the matmul yields the mean directly;
    #  acts >= 0 after ReLU so sum == sum(|.|)).
    diff = hrec - h_f32
    l_rec = jnp.dot(diff * diff, sel_rec_ref[...],
                    preferred_element_type=jnp.float32)          # (Bt, I)
    l_sp = jnp.dot(acts, sel_sp_ref[...],
                   preferred_element_type=jnp.float32)           # (Bt, I)
    # Single merged loss output (Bt, 2*I): [L_reconstruction | L_sparsity].
    loss_ref[...] = jnp.concatenate([l_rec, l_sp], axis=-1)


def toy_sae_forward(h, w_enc, w_dec, b_enc, b_dec,
                    *, sparsity_coeff=0.2, weight_normalize_eps=1e-8,
                    batch_block=None):
    """h: (batch, inst, d_in) -> (loss_dict, loss, acts_post, h_reconstructed)."""
    batch, n_inst, d_in = h.shape
    d_sae = w_enc.shape[-1]
    out_dtype = h.dtype
    itemsize = jnp.dtype(out_dtype).itemsize

    # dtype-aware sublane alignment: f32 -> 8, bf16 -> 16, int8/fp8 -> 32.
    sublane = {4: 8, 2: 16, 1: 32}[itemsize]

    if batch_block is None:
        if batch <= 256:
            batch_block = batch
        else:
            # >= 2 grid steps so the "parallel" axis can shard over v7x's 2 TCs,
            # while keeping the largest tile that fits VMEM comfortably.
            cand = min(512, batch // 2)
            cand -= cand % sublane
            batch_block = cand if (cand > 0 and batch % cand == 0) else batch
    assert batch % batch_block == 0, "batch must be divisible by batch_block"
    assert batch_block == batch or batch_block % sublane == 0, (
        f"batch_block must be a multiple of {sublane} for dtype {out_dtype} "
        "(or equal the full batch)")

    # ---- One-time weight preprocessing (hoisted out of the batch-tile loop) ----
    # Decoder normalization: exact reciprocal (matches reference / 1e-5 parity).
    w_dec_f32 = w_dec.astype(jnp.float32)
    dec_norm = jnp.sqrt(jnp.sum(w_dec_f32 * w_dec_f32, axis=-1, keepdims=True))
    w_dec_n = (w_dec_f32 / (dec_norm + weight_normalize_eps)).astype(w_enc.dtype)

    # Block-diagonal fold of all instances into one matmul pair.  Off-diagonal
    # blocks are zero, so the single flat matmul reproduces the per-instance
    # einsums exactly.
    bd_bytes = 2 * (n_inst * n_inst * d_in * d_sae) * itemsize
    # TODO(synk): for very large n_inst, fall back to streaming instances in
    # groups (block-diag per group) instead of one fold; not needed here.
    assert bd_bytes <= 16 * 1024 * 1024, (
        "block-diagonal weights would not fit comfortably in VMEM; reduce "
        "n_inst or add an instance-grouped fallback")
    eye_w = jnp.eye(n_inst, dtype=w_enc.dtype)
    w_enc_bd = jnp.einsum('ij,ids->idjs', eye_w, w_enc).reshape(
        n_inst * d_in, n_inst * d_sae)
    w_dec_bd = jnp.einsum('ij,isd->isjd', eye_w, w_dec_n).reshape(
        n_inst * d_sae, n_inst * d_in)

    b_enc_flat = b_enc.reshape(1, n_inst * d_sae)
    b_dec_flat = b_dec.reshape(1, n_inst * d_in)

    # 0/1 selector matrices for the per-instance loss reductions (MXU-side).
    eye_f32 = jnp.eye(n_inst, dtype=jnp.float32)
    sel_rec = jnp.repeat(eye_f32, d_in, axis=0) * (1.0 / d_in)   # (I*d_in, I)
    sel_sp = jnp.repeat(eye_f32, d_sae, axis=0)                  # (I*d_sae, I)

    # Layout-preserving merge of the trailing (inst, feat) dims (no transpose).
    h2 = h.reshape(batch, n_inst * d_in)

    grid = (batch // batch_block,)
    const2 = lambda b: (0, 0)      # weights/biases/selectors stay VMEM-resident

    grid_spec = pltpu.PrefetchScalarGridSpec(
        num_scalar_prefetch=0,
        grid=grid,
        in_specs=[
            # Activations stream over the batch grid axis.
            pl.BlockSpec((batch_block, n_inst * d_in), lambda b: (b, 0)),
            # Weights / biases / selectors: constant block index -> resident.
            pl.BlockSpec((n_inst * d_in, n_inst * d_sae), const2),
            pl.BlockSpec((n_inst * d_sae, n_inst * d_in), const2),
            pl.BlockSpec((1, n_inst * d_sae), const2),
            pl.BlockSpec((1, n_inst * d_in), const2),
            pl.BlockSpec((n_inst * d_in, n_inst), const2),
            pl.BlockSpec((n_inst * d_sae, n_inst), const2),
        ],
        out_specs=[
            pl.BlockSpec((batch_block, n_inst * d_sae), lambda b: (b, 0)),
            pl.BlockSpec((batch_block, n_inst * d_in), lambda b: (b, 0)),
            pl.BlockSpec((batch_block, 2 * n_inst), lambda b: (b, 0)),
        ],
    )

    # VMEM budget: double-buffered streamed blocks + resident weights + f32
    # intermediates; clamp below v7x's 64 MiB physical VMEM.
    blk_in = batch_block * n_inst * d_in
    blk_sae = batch_block * n_inst * d_sae
    stream_bytes = 2 * ((2 * blk_in + blk_sae) * itemsize
                        + batch_block * 2 * n_inst * 4)
    weight_bytes = 2 * (bd_bytes
                        + (n_inst * d_in + n_inst * d_sae) * n_inst * 4
                        + n_inst * (d_in + d_sae) * itemsize)
    interm_bytes = 5 * (blk_in + blk_sae) * 4
    vmem_limit = int(min(max(2 * (stream_bytes + weight_bytes + interm_bytes),
                             32 << 20), 56 << 20))

    acts2, hrec2, losses = pl.pallas_call(
        _toy_sae_kernel,
        out_shape=(
            jax.ShapeDtypeStruct((batch, n_inst * d_sae), out_dtype),
            jax.ShapeDtypeStruct((batch, n_inst * d_in), out_dtype),
            jax.ShapeDtypeStruct((batch, 2 * n_inst), jnp.float32),
        ),
        grid_spec=grid_spec,
        compiler_params=pltpu.CompilerParams(
            dimension_semantics=("parallel",),
            vmem_limit_bytes=vmem_limit),
    )(h2, w_enc_bd, w_dec_bd, b_enc_flat, b_dec_flat, sel_rec, sel_sp)

    # Layout-preserving splits back to (batch, inst, ...) shapes.
    acts_post = acts2.reshape(batch, n_inst, d_sae)
    h_reconstructed = hrec2.reshape(batch, n_inst, d_in)

    l_rec = losses[:, :n_inst]
    l_sp = losses[:, n_inst:]
    total_loss = l_rec + sparsity_coeff * l_sp
    loss_dict = {"L_reconstruction": l_rec, "L_sparsity": l_sp}
    return loss_dict, total_loss, acts_post, h_reconstructed


def _reference_forward(h, w_enc, w_dec, b_enc, b_dec,
                       *, sparsity_coeff=0.2, weight_normalize_eps=1e-8):
    h_cent = h - b_dec[None]
    acts_pre = jnp.einsum('bid,ids->bis', h_cent, w_enc) + b_enc[None]
    acts_post = jax.nn.relu(acts_pre)
    w_dec_n = w_dec / (jnp.linalg.norm(w_dec, axis=-1, keepdims=True)
                       + weight_normalize_eps)
    h_rec = jnp.einsum('bis,isd->bid', acts_post, w_dec_n) + b_dec[None]
    l_rec = jnp.mean((h_rec - h) ** 2, axis=-1)
    l_sp = jnp.sum(jnp.abs(acts_post), axis=-1)
    loss = l_rec + sparsity_coeff * l_sp
    return {"L_reconstruction": l_rec, "L_sparsity": l_sp}, loss, acts_post, h_rec


if __name__ == "__main__":
    # Small synthetic ToySAE config: n_inst=4, d_in=16, d_sae=32.
    n_inst, d_in, d_sae = 4, 16, 32
    key = jax.random.PRNGKey(0)
    k_h, k_we, k_wd, k_be, k_bd = jax.random.split(key, 5)

    bound_e = (6.0 / d_in) ** 0.5
    bound_d = (6.0 / d_sae) ** 0.5
    W_enc = jax.random.uniform(k_we, (n_inst, d_in, d_sae),
                               minval=-bound_e, maxval=bound_e, dtype=jnp.float32)
    W_dec = jax.random.uniform(k_wd, (n_inst, d_sae, d_in),
                               minval=-bound_d, maxval=bound_d, dtype=jnp.float32)
    # __init__ uses zeros; small random values exercise the full path.
    b_enc = 0.1 * jax.random.normal(k_be, (n_inst, d_sae), dtype=jnp.float32)
    b_dec = 0.1 * jax.random.normal(k_bd, (n_inst, d_in), dtype=jnp.float32)

    def run_and_check(batch, batch_block, dtype, rtol, atol):
        hk = jax.random.fold_in(k_h, batch)
        h = jax.random.normal(hk, (batch, n_inst, d_in), dtype=jnp.float32)
        ld, loss, acts, hrec = toy_sae_forward(
            h.astype(dtype), W_enc.astype(dtype), W_dec.astype(dtype),
            b_enc.astype(dtype), b_dec.astype(dtype), batch_block=batch_block)
        jax.block_until_ready((ld, loss, acts, hrec))
        ref_ld, ref_loss, ref_acts, ref_hrec = _reference_forward(
            h, W_enc, W_dec, b_enc, b_dec)
        np.testing.assert_allclose(np.asarray(acts.astype(jnp.float32)),
                                   np.asarray(ref_acts), rtol=rtol, atol=atol)
        np.testing.assert_allclose(np.asarray(hrec.astype(jnp.float32)),
                                   np.asarray(ref_hrec), rtol=rtol, atol=atol)
        np.testing.assert_allclose(np.asarray(ld["L_reconstruction"]),
                                   np.asarray(ref_ld["L_reconstruction"]),
                                   rtol=rtol, atol=atol)
        np.testing.assert_allclose(np.asarray(ld["L_sparsity"]),
                                   np.asarray(ref_ld["L_sparsity"]),
                                   rtol=rtol, atol=atol)
        np.testing.assert_allclose(np.asarray(loss), np.asarray(ref_loss),
                                   rtol=rtol, atol=atol)

    # 1) f32, single grid step (grid=(1,)).
    run_and_check(batch=8, batch_block=None, dtype=jnp.float32, rtol=1e-5, atol=1e-5)
    # 2) f32, multi-tile grid=(4,): exercises weight residency across batch tiles
    #    and the parallel batch axis.
    run_and_check(batch=64, batch_block=16, dtype=jnp.float32, rtol=1e-5, atol=1e-5)
    # 3) bf16 storage / matmul dtype, multi-tile grid=(2,); loose tolerance vs
    #    the f32 reference (losses still f32-accumulated in-kernel).
    run_and_check(batch=32, batch_block=16, dtype=jnp.bfloat16, rtol=1e-1, atol=1e-1)

    # TODO(synk): generate_batch / optimize / resample_simple / resample_advanced
    # are training utilities, not part of the forward hot path, and are not
    # implemented as kernels.
    print("KERNEL_OK")
</pallas_src>

<mosaic_0001>
module attributes {stable_mosaic.version = 11 : i64} {
  func.func @_toy_sae_kernel(%arg0: i32, %arg1: memref<8x64xf32, #tpu.memory_space<vmem>>, %arg2: memref<64x128xf32, #tpu.memory_space<vmem>>, %arg3: memref<128x64xf32, #tpu.memory_space<vmem>>, %arg4: memref<1x128xf32, #tpu.memory_space<vmem>>, %arg5: memref<1x64xf32, #tpu.memory_space<vmem>>, %arg6: memref<64x4xf32, #tpu.memory_space<vmem>>, %arg7: memref<128x4xf32, #tpu.memory_space<vmem>>, %arg8: memref<8x128xf32, #tpu.memory_space<vmem>>, %arg9: memref<8x64xf32, #tpu.memory_space<vmem>>, %arg10: memref<8x8xf32, #tpu.memory_space<vmem>>) attributes {dimension_semantics = [#tpu.dimension_semantics<parallel>], iteration_bounds = array<i64: 1>, scalar_prefetch = 0 : i64, scratch_operands = 0 : i64, tpu.core_type = #tpu.core_type<tc>, window_params = [{transform_indices = @transform_0, window_bounds = array<i64: 8, 64>}, {pipeline_mode = #tpu.pipeline_mode<synchronous>, transform_indices = @transform_1, window_bounds = array<i64: 64, 128>}, {pipeline_mode = #tpu.pipeline_mode<synchronous>, transform_indices = @transform_2, window_bounds = array<i64: 128, 64>}, {pipeline_mode = #tpu.pipeline_mode<synchronous>, transform_indices = @transform_3, window_bounds = array<i64: 1, 128>}, {pipeline_mode = #tpu.pipeline_mode<synchronous>, transform_indices = @transform_4, window_bounds = array<i64: 1, 64>}, {pipeline_mode = #tpu.pipeline_mode<synchronous>, transform_indices = @transform_5, window_bounds = array<i64: 64, 4>}, {pipeline_mode = #tpu.pipeline_mode<synchronous>, transform_indices = @transform_6, window_bounds = array<i64: 128, 4>}, {transform_indices = @transform_7, window_bounds = array<i64: 8, 128>}, {transform_indices = @transform_8, window_bounds = array<i64: 8, 64>}, {transform_indices = @transform_9, window_bounds = array<i64: 8, 8>}]} {
    %c0 = arith.constant 0 : index
    %c0_0 = arith.constant 0 : index
    %0 = vector.load %arg1[%c0, %c0_0] : memref<8x64xf32, #tpu.memory_space<vmem>>, vector<8x64xf32>
    %c0_1 = arith.constant 0 : index
    %c0_2 = arith.constant 0 : index
    %1 = vector.load %arg5[%c0_1, %c0_2] : memref<1x64xf32, #tpu.memory_space<vmem>>, vector<1x64xf32>
    %2 = vector.broadcast %1 : vector<1x64xf32> to vector<8x64xf32>
    %3 = arith.subf %0, %2 : vector<8x64xf32>
    %c0_3 = arith.constant 0 : index
    %c0_4 = arith.constant 0 : index
    %4 = vector.load %arg2[%c0_3, %c0_4] : memref<64x128xf32, #tpu.memory_space<vmem>>, vector<64x128xf32>
    %cst = arith.constant dense<0.000000e+00> : vector<8x128xf32>
    %5 = tpu.matmul %3, %4, %cst {dimension_numbers = #tpu.dot_dimension_numbers<[1], [0], [0], [1], [0, 0, 1, 1], [], []>} : vector<8x64xf32>, vector<64x128xf32>, vector<8x128xf32> -> vector<8x128xf32>
    %c0_5 = arith.constant 0 : index
    %c0_6 = arith.constant 0 : index
    %6 = vector.load %arg4[%c0_5, %c0_6] : memref<1x128xf32, #tpu.memory_space<vmem>>, vector<1x128xf32>
    %7 = vector.broadcast %6 : vector<1x128xf32> to vector<8x128xf32>
    %8 = arith.addf %5, %7 : vector<8x128xf32>
    %cst_7 = arith.constant 0.000000e+00 : f32
    %9 = vector.broadcast %cst_7 : f32 to vector<8x128xf32>
    %10 = arith.maximumf %8, %9 : vector<8x128xf32>
    %c0_8 = arith.constant 0 : index
    %c0_9 = arith.constant 0 : index
    %11 = vector.load %arg3[%c0_8, %c0_9] : memref<128x64xf32, #tpu.memory_space<vmem>>, vector<128x64xf32>
    %cst_10 = arith.constant dense<0.000000e+00> : vector<8x64xf32>
    %12 = tpu.matmul %10, %11, %cst_10 {dimension_numbers = #tpu.dot_dimension_numbers<[1], [0], [0], [1], [0, 0, 1, 1], [], []>} : vector<8x128xf32>, vector<128x64xf32>, vector<8x64xf32> -> vector<8x64xf32>
    %13 = vector.broadcast %1 : vector<1x64xf32> to vector<8x64xf32>
    %14 = arith.addf %12, %13 : vector<8x64xf32>
    %c0_11 = arith.constant 0 : index
    %c0_12 = arith.constant 0 : index
    %15 = vector.load %arg8[%c0_11, %c0_12] : memref<8x128xf32, #tpu.memory_space<vmem>>, vector<8x128xf32>
    tpu.vector_store %arg8[%c0_11, %c0_12], %10 {strides = array<i32>} : memref<8x128xf32, #tpu.memory_space<vmem>>, vector<8x128xf32>,
    %c0_13 = arith.constant 0 : index
    %c0_14 = arith.constant 0 : index
    %16 = vector.load %arg9[%c0_13, %c0_14] : memref<8x64xf32, #tpu.memory_space<vmem>>, vector<8x64xf32>
    tpu.vector_store %arg9[%c0_13, %c0_14], %14 {strides = array<i32>} : memref<8x64xf32, #tpu.memory_space<vmem>>, vector<8x64xf32>,
    %17 = arith.subf %14, %0 : vector<8x64xf32>
    %18 = arith.mulf %17, %17 : vector<8x64xf32>
    %c0_15 = arith.constant 0 : index
    %c0_16 = arith.constant 0 : index
    %19 = vector.load %arg6[%c0_15, %c0_16] : memref<64x4xf32, #tpu.memory_space<vmem>>, vector<64x4xf32>
    %cst_17 = arith.constant dense<0.000000e+00> : vector<8x4xf32>
    %20 = tpu.matmul %18, %19, %cst_17 {dimension_numbers = #tpu.dot_dimension_numbers<[1], [0], [0], [1], [0, 0, 1, 1], [], []>} : vector<8x64xf32>, vector<64x4xf32>, vector<8x4xf32> -> vector<8x4xf32>
    %c0_18 = arith.constant 0 : index
    %c0_19 = arith.constant 0 : index
    %21 = vector.load %arg7[%c0_18, %c0_19] : memref<128x4xf32, #tpu.memory_space<vmem>>, vector<128x4xf32>
    %cst_20 = arith.constant dense<0.000000e+00> : vector<8x4xf32>
    %22 = tpu.matmul %10, %21, %cst_20 {dimension_numbers = #tpu.dot_dimension_numbers<[1], [0], [0], [1], [0, 0, 1, 1], [], []>} : vector<8x128xf32>, vector<128x4xf32>, vector<8x4xf32> -> vector<8x4xf32>
    %23 = tpu.concatenate %20, %22 in 1 : vector<8x4xf32>, vector<8x4xf32> -> vector<8x8xf32>
    %c0_21 = arith.constant 0 : index
    %c0_22 = arith.constant 0 : index
    %24 = vector.load %arg10[%c0_21, %c0_22] : memref<8x8xf32, #tpu.memory_space<vmem>>, vector<8x8xf32>
    tpu.vector_store %arg10[%c0_21, %c0_22], %23 {strides = array<i32>} : memref<8x8xf32, #tpu.memory_space<vmem>>, vector<8x8xf32>,
    return
  }
  func.func @transform_0(%arg0: i32) -> (i32, i32) {
    %c0_i32 = arith.constant 0 : i32
    %c0_i32_0 = arith.constant 0 : i32
    return %arg0, %c0_i32 : i32, i32
  }
  func.func @transform_1(%arg0: i32) -> (i32, i32) {
    %c0_i32 = arith.constant 0 : i32
    %c0_i32_0 = arith.constant 0 : i32
    %c0_i32_1 = arith.constant 0 : i32
    return %c0_i32, %c0_i32_0 : i32, i32
  }
  func.func @transform_2(%arg0: i32) -> (i32, i32) {
    %c0_i32 = arith.constant 0 : i32
    %c0_i32_0 = arith.constant 0 : i32
    %c0_i32_1 = arith.constant 0 : i32
    return %c0_i32, %c0_i32_0 : i32, i32
  }
  func.func @transform_3(%arg0: i32) -> (i32, i32) {
    %c0_i32 = arith.constant 0 : i32
    %c0_i32_0 = arith.constant 0 : i32
    %c0_i32_1 = arith.constant 0 : i32
    return %c0_i32, %c0_i32_0 : i32, i32
  }
  func.func @transform_4(%arg0: i32) -> (i32, i32) {
    %c0_i32 = arith.constant 0 : i32
    %c0_i32_0 = arith.constant 0 : i32
    %c0_i32_1 = arith.constant 0 : i32
    return %c0_i32, %c0_i32_0 : i32, i32
  }
  func.func @transform_5(%arg0: i32) -> (i32, i32) {
    %c0_i32 = arith.constant 0 : i32
    %c0_i32_0 = arith.constant 0 : i32
    %c0_i32_1 = arith.constant 0 : i32
    return %c0_i32, %c0_i32_0 : i32, i32
  }
  func.func @transform_6(%arg0: i32) -> (i32, i32) {
    %c0_i32 = arith.constant 0 : i32
    %c0_i32_0 = arith.constant 0 : i32
    %c0_i32_1 = arith.constant 0 : i32
    return %c0_i32, %c0_i32_0 : i32, i32
  }
  func.func @transform_7(%arg0: i32) -> (i32, i32) {
    %c0_i32 = arith.constant 0 : i32
    %c0_i32_0 = arith.constant 0 : i32
    return %arg0, %c0_i32 : i32, i32
  }
  func.func @transform_8(%arg0: i32) -> (i32, i32) {
    %c0_i32 = arith.constant 0 : i32
    %c0_i32_0 = arith.constant 0 : i32
    return %arg0, %c0_i32 : i32, i32
  }
  func.func @transform_9(%arg0: i32) -> (i32, i32) {
    %c0_i32 = arith.constant 0 : i32
    %c0_i32_0 = arith.constant 0 : i32
    return %arg0, %c0_i32 : i32, i32
  }
}

</mosaic_0001>

<bundles_post_ra>
// kernel: tpu_custom_call.1
= control target key start
LH: loop header
LB: loop body
LE: loop exit
PB: predicated region body
PF: predicated region fallthrough
CT: control target
= control target key end

     0   :  { %15 = vsyncpa [#allocation3], 0  ;;  %v749_v3 = vmov 0.0|0.0   ;;  %vm750_vm0 = vmmov 0   ;;  %v751_v6 = vmov 0.0   ;;  %s1038_s0 = inlined_call_operand.vmem [shape: f32[8,64], index: 0, kind: input, shape index: {}]   ;;  %s1039_s1 = inlined_call_operand.vmem [shape: f32[64,128], index: 1, kind: input, shape index: {}]   ;;  %s1040_s2 = inlined_call_operand.vmem [shape: f32[128,64], index: 2, kind: input, shape index: {}]   ;;  %s1041_s3 = inlined_call_operand.vmem [shape: f32[1,128], index: 3, kind: input, shape index: {}]   ;;  %s1042_s4 = inlined_call_operand.vmem [shape: f32[1,64], index: 4, kind: input, shape index: {}]   ;;  %s1043_s5 = inlined_call_operand.vmem [shape: f32[64,4], index: 5, kind: input, shape index: {}]   ;;  %s1044_s6 = inlined_call_operand.vmem [shape: f32[128,4], index: 6, kind: input, shape index: {}]   ;;  %s1045_s7 = inlined_call_operand.hbm [shape: f32[8,128], index: 7, kind: output, shape index: {0}]   ;;  %s1046_s8 = inlined_call_operand.hbm [shape: f32[8,64], index: 8, kind: output, shape index: {1}]   ;;  %s1047_s9 = inlined_call_operand.hbm [shape: f32[8,8], index: 9, kind: output, shape index: {2}]  }
   0x1   :  { %v40_v0 = vld [vmem:[%s1039_s1] sm:$0xff]  ;;  %v41_v1 = vld [vmem:[%s1039_s1 + $0x8] sm:$0xff]  ;;  %v42_v2 = vld [vmem:[%s1039_s1 + $0x10] sm:$0xff]  ;;  %600 = vmatprep.subr.bf16.mxu1 %v749_v3  ;;  %508 = vmatprep.mubr.msk.f32.mxu1 %vm750_vm0, %v751_v6 }
   0x2   :  { %v601_v4 = vpack.c.bf16 %v41_v1, %v40_v0  ;;  %v43_v5 = vld [vmem:[%s1039_s1 + $0x18] sm:$0xff]  ;;  %636 = vmatprep.subr.bf16.mxu0 %v749_v3  ;;  %562 = vmatprep.mubr.msk.f32.mxu0 %vm750_vm0, %v751_v6  ;;  %v44_v8 = vld [vmem:[%s1039_s1 + $0x20] sm:$0xff]  ;;  %v45_v9 = vld [vmem:[%s1039_s1 + $0x28] sm:$0xff] }
   0x3   :  { %v604_v7 = vpack.c.bf16 %v43_v5, %v42_v2  ;;  %v607_v10 = vpack.c.bf16 %v45_v9, %v44_v8  ;;  %v46_v11 = vld [vmem:[%s1039_s1 + $0x30] sm:$0xff]  ;;  %v47_v12 = vld [vmem:[%s1039_s1 + $0x38] sm:$0xff] }
   0x4   :  { %602 = vmatpush3.bf16.msra.mxu1 %v601_v4 }
   0x5   :  { %603 = vmatprep.subr.bf16.mxu1 %v749_v3 }
   0x8   :  { %605 = vmatpush3.bf16.msra.mxu1 %v604_v7 }
   0x9   :  { %606 = vmatprep.subr.bf16.mxu1 %v749_v3 }
   0xa   :  { %16 = vsyncpa [#allocation5], 0  ;;  %v610_v13 = vpack.c.bf16 %v47_v12, %v46_v11  ;;  %v841_v14 = vld [vmem:[%s1038_s0] sm:$0xff]  ;;  %v131_v17 = vld [vmem:[%s1040_s2 + $0x8] sm:$0xff]  ;;  %vm55_vm1 = vcmask 523264   ;;  %s752_s0 = smov [#allocation4]  }
   0xb   :  { %v846_v15 = vld [vmem:[%s1042_s4] ss:$0 sm:$0xff]  ;;  %v132_v20 = vld [vmem:[%s1040_s2 + $0x10] sm:$0xff]  ;;  %v133_v21 = vld [vmem:[%s1040_s2 + $0x18] sm:$0xff]  ;;  %s411_s4 = sshll.u32 %s752_s0, 4  ;;  %s753_s11 = smov [#allocation2]   ;;  %s412_s4 = int_to_ptr.vmem [resolvable:$true] %s411_s4 }
   0xc   :  { %608 = vmatpush3.bf16.msra.mxu1 %v607_v10  ;;  %v130_v16 = vld [vmem:[%s1040_s2] sm:$0xff]  ;;  %v39_v18 = vsub.f32 %v841_v14, %v846_v15  ;;  %v616_v22 = vpack.c.bf16 %v133_v21, %v132_v20  ;;  %v135_v24 = vld [vmem:[%s1040_s2 + $0x28] sm:$0xff]  ;;  %v136_v26 = vld [vmem:[%s1040_s2 + $0x30] sm:$0xff]  ;;  %s401_s12 = sshll.u32 %s753_s11, 4  ;;  %s679_s13 = scalar_lea.vmem %s412_s4, 128  ;;  %s402_s12 = int_to_ptr.vmem [resolvable:$true] %s401_s12 }
   0xd   :  { %609 = vmatprep.subr.bf16.mxu1 %v749_v3  ;;  %v613_v19 = vpack.c.bf16 %v131_v17, %v130_v16  ;;  %v134_v23 = vld [vmem:[%s1040_s2 + $0x20] sm:$0xff]  ;;  %v137_v27 = vld [vmem:[%s1040_s2 + $0x38] sm:$0xff]  ;;  %v139_v30 = vld [vmem:[%s1040_s2 + $0x48] sm:$0xff]  ;;  %p680_p0 = scmp.ne.s32.totalorder %s412_s4, %s679_s13  ;;  %p684_p1 = scmp.lt.s32.totalorder %s412_s4, %s412_s4 }
   0xe   :  { %v619_v25 = vpack.c.bf16 %v135_v24, %v134_v23  ;;  %v622_v28 = vpack.c.bf16 %v137_v27, %v136_v26  ;;  %v138_v29 = vld [vmem:[%s1040_s2 + $0x40] sm:$0xff]  ;;  %v140_v32 = vld [vmem:[%s1040_s2 + $0x50] sm:$0xff]  ;;  %v141_v33 = vld [vmem:[%s1040_s2 + $0x58] sm:$0xff]  ;;  %p685_p2 = scmp.lt.s32.totalorder %s679_s13, %s679_s13 }
   0xf   :  { %v625_v31 = vpack.c.bf16 %v139_v30, %v138_v29  ;;  %v628_v34 = vpack.c.bf16 %v141_v33, %v140_v32  ;;  %v142_v35 = vld [vmem:[%s1040_s2 + $0x60] sm:$0xff]  ;;  %v143_v36 = vld [vmem:[%s1040_s2 + $0x68] sm:$0xff]  ;;  %v144_v38 = vld [vmem:[%s1040_s2 + $0x70] sm:$0xff] }
  0x10   :  { %611 = vmatpush3.bf16.msra.mxu1 %v610_v13  ;;  %v631_v37 = vpack.c.bf16 %v143_v36, %v142_v35  ;;  %v145_v39 = vld [vmem:[%s1040_s2 + $0x78] sm:$0xff]  ;;  %v220_v41 = vld [vmem:[%s1043_s5] sm:$0xff]  ;;  %v221_v42 = vld [vmem:[%s1043_s5 + $0x8] sm:$0xff]  ;;  %p686_p3 = por %p685_p2, %p684_p1 }
  0x11   :  { %612 = vmatprep.subr.bf16.mxu1 %v749_v3  ;;  %v634_v40 = vpack.c.bf16 %v145_v39, %v144_v38  ;;  %v222_v43 = vld [vmem:[%s1043_s5 + $0x10] sm:$0xff]  ;;  %v637_v44 = vpack.c.bf16 %v221_v42, %v220_v41  ;;  %v223_v45 = vld [vmem:[%s1043_s5 + $0x18] sm:$0xff]  ;;  %v224_v47 = vld [vmem:[%s1043_s5 + $0x20] sm:$0xff] }
  0x12   :  { %v640_v46 = vpack.c.bf16 %v223_v45, %v222_v43  ;;  %v225_v48 = vld [vmem:[%s1043_s5 + $0x28] sm:$0xff]  ;;  %v437_v50 = vld [vmem:[%s1041_s3] ss:$0 sm:$0xff]  ;;  %v226_v55 = vld [vmem:[%s1043_s5 + $0x30] sm:$0xff]  ;;  %p687_p4 = pnand %p686_p3, %p680_p0 }
  0x13   :  { %509 = vmatmul.mubr.msk.f32.vlgmr.msra.gmra.mrb[0].mxu1 %vm55_vm1, %v39_v18  ;;  %638 = vmatpush3.bf16.msra.mxu0 %v637_v44  ;;  %v643_v49 = vpack.c.bf16 %v225_v48, %v224_v47  ;;  %v227_v56 = vld [vmem:[%s1043_s5 + $0x38] sm:$0xff]  ;;  %v301_v61 = vld [vmem:[%s1044_s6] sm:$0xff]  ;;  %v302_v62 = vld [vmem:[%s1044_s6 + $0x8] sm:$0xff] }
  0x14   :  { %614 = vmatpush3.bf16.msra.mxu1 %v613_v19  ;;  %543 = vmatprep.mubr.msk.f32.mxu1 %vm750_vm0, %v751_v6  ;;  %v646_v57 = vpack.c.bf16 %v227_v56, %v226_v55  ;;  %v649_v0 = vpack.c.bf16 %v302_v62, %v301_v61  ;;  %v303_v2 = vld [vmem:[%s1044_s6 + $0x10] sm:$0xff]  ;;  %v304_v4 = vld [vmem:[%s1044_s6 + $0x18] sm:$0xff]  ;;  %v305_v7 = vld [vmem:[%s1044_s6 + $0x20] sm:$0xff] }
  0x15   :  { %615 = vmatprep.subr.bf16.mxu1 %v749_v3  ;;  %639 = vmatprep.subr.bf16.mxu0 %v749_v3  ;;  %v652_v5 = vpack.c.bf16 %v304_v4, %v303_v2  ;;  %v306_v8 = vld [vmem:[%s1044_s6 + $0x28] sm:$0xff]  ;;  %v307_v10 = vld [vmem:[%s1044_s6 + $0x30] sm:$0xff]  ;;  %v309_v12 = vld [vmem:[%s1044_s6 + $0x40] sm:$0xff] }
  0x16   :  { %v655_v9 = vpack.c.bf16 %v306_v8, %v305_v7  ;;  %v310_v13 = vld [vmem:[%s1044_s6 + $0x48] sm:$0xff]  ;;  %v312_v16 = vld [vmem:[%s1044_s6 + $0x58] sm:$0xff]  ;;  %v313_v18 = vld [vmem:[%s1044_s6 + $0x60] sm:$0xff] }
  0x17   :  { %641 = vmatpush3.bf16.msra.mxu0 %v640_v46  ;;  %v314_v19 = vld [vmem:[%s1044_s6 + $0x68] sm:$0xff]  ;;  %v315_v21 = vld [vmem:[%s1044_s6 + $0x70] sm:$0xff] }
  0x18   :  { %617 = vmatpush3.bf16.msra.mxu1 %v616_v22  ;;  %642 = vmatprep.subr.bf16.mxu0 %v749_v3  ;;  %v667_v20 = vpack.c.bf16 %v314_v19, %v313_v18  ;;  %v316_v22 = vld [vmem:[%s1044_s6 + $0x78] sm:$0xff] }
  0x19   :  { %618 = vmatprep.subr.bf16.mxu1 %v749_v3  ;;  %v670_v23 = vpack.c.bf16 %v316_v22, %v315_v21 }
  0x1b   :  { %644 = vmatpush3.bf16.msra.mxu0 %v643_v49 }
  0x1c   :  { %620 = vmatpush3.bf16.msra.mxu1 %v619_v25  ;;  %645 = vmatprep.subr.bf16.mxu0 %v749_v3 }
  0x1d   :  { %621 = vmatprep.subr.bf16.mxu1 %v749_v3 }
  0x1f   :  { %647 = vmatpush3.bf16.msra.mxu0 %v646_v57 }
  0x20   :  { %623 = vmatpush3.bf16.msra.mxu1 %v622_v28  ;;  %648 = vmatprep.subr.bf16.mxu0 %v749_v3 }
  0x21   :  { %624 = vmatprep.subr.bf16.mxu1 %v749_v3 }
  0x24   :  { %626 = vmatpush3.bf16.msra.mxu1 %v625_v31 }
  0x25   :  { %627 = vmatprep.subr.bf16.mxu1 %v749_v3 }
  0x28   :  { %629 = vmatpush3.bf16.msra.mxu1 %v628_v34 }
  0x29   :  { %630 = vmatprep.subr.bf16.mxu1 %v749_v3 }
  0x2c   :  { %632 = vmatpush3.bf16.msra.mxu1 %v631_v37 }
  0x2d   :  { %633 = vmatprep.subr.bf16.mxu1 %v749_v3 }
  0x30   :  { %635 = vmatpush3.bf16.msra.mxu1 %v634_v40 }
  0xe6   :  { %v125_v51 = vpop.f32.mrb[0].mxu1 }
  0xe7   :  { %v126_v52 = vadd.f32 %v437_v50, %v125_v51  ;;  %v510_v53 = vpop.f32.mrb[1].mxu1 }
  0xe9   :  { %v129_v54 = vmax.f32 %v126_v52, 0.0 }
  0xeb   :  { %216 = vst [vmem:[#allocation2] sm:$0xff] %v129_v54  ;;  %544 = vmatmul.mubr.f32.vlgmr.msra.gmra.mrb[2].mxu1 %v129_v54 }
 0x1be   :  { %v212_v58 = vpop.f32.mrb[2].mxu1 }
 0x1bf   :  { %v213_v59 = vadd.f32 %v846_v15, %v212_v58  ;;  %v545_v60 = vpop.f32.mrb[3].mxu1  ;;  %v311_v15 = vld [vmem:[%s1044_s6 + $0x50] sm:$0xff] }
 0x1c0   :  { %v664_v17 = vpack.c.bf16 %v312_v16, %v311_v15 }
 0x1c1   :  { %v218_v63 = vsub.f32 %v213_v59, %v841_v14  ;;  %217 = vst.msk [vmem:[#allocation4] sm:$0xff] %vm55_vm1, %v213_v59  ;;  %v661_v14 = vpack.c.bf16 %v310_v13, %v309_v12 }
 0x1c3   :  { %v219_v1 = vmul.f32 %v218_v63, %v218_v63 }
 0x1c5   :  { %563 = vmatmul.mubr.msk.f32.vlgmr.msra.gmra.mrb[0].mxu0 %vm55_vm1, %v219_v1 }
 0x1c6   :  { %650 = vmatpush3.bf16.msra.mxu0 %v649_v0  ;;  %597 = vmatprep.mubr.msk.f32.mxu0 %vm750_vm0, %v751_v6  ;;  %v308_v6 = vld [vmem:[%s1044_s6 + $0x38] sm:$0xff] }
 0x1c7   :  { %651 = vmatprep.subr.bf16.mxu0 %v749_v3  ;;  %v658_v11 = vpack.c.bf16 %v308_v6, %v307_v10 }
 0x1ca   :  { %653 = vmatpush3.bf16.msra.mxu0 %v652_v5 }
 0x1cb   :  { %654 = vmatprep.subr.bf16.mxu0 %v749_v3 }
 0x1ce   :  { %656 = vmatpush3.bf16.msra.mxu0 %v655_v9 }
 0x1cf   :  { %657 = vmatprep.subr.bf16.mxu0 %v749_v3 }
 0x1d2   :  { %659 = vmatpush3.bf16.msra.mxu0 %v658_v11 }
 0x1d3   :  { %660 = vmatprep.subr.bf16.mxu0 %v749_v3 }
 0x1d6   :  { %662 = vmatpush3.bf16.msra.mxu0 %v661_v14 }
 0x1d7   :  { %663 = vmatprep.subr.bf16.mxu0 %v749_v3 }
 0x1da   :  { %665 = vmatpush3.bf16.msra.mxu0 %v664_v17 }
 0x1db   :  { %666 = vmatprep.subr.bf16.mxu0 %v749_v3 }
 0x1de   :  { %668 = vmatpush3.bf16.msra.mxu0 %v667_v20 }
 0x1df   :  { %669 = vmatprep.subr.bf16.mxu0 %v749_v3 }
 0x1e2   :  { %671 = vmatpush3.bf16.msra.mxu0 %v670_v23 }
 0x1e5   :  { %598 = vmatmul.mubr.f32.vlgmr.msra.gmra.mrb[2].mxu0 %v129_v54 }
 0x298   :  { %v297_v24 = vpop.f32.mrb[0].mxu0 }
 0x299   :  { %v564_v25 = vpop.f32.mrb[1].mxu0 }
 0x29a   :  { %690 = shalt.err (!%p687_p4)
}
 0x29b   :  { %s691_s15 = scalar_lea.hbm %s1046_s8, 128 }
 0x29c   :  { %p692_p5 = scmp.ne.s32.totalorder %s1046_s8, %s691_s15  ;;  %p695_p6 = scmp.lt.u32.totalorder %s691_s15, %s1046_s8 }
 0x29e   :  { %p697_p7 = pnand %p695_p6, %p692_p5 }
 0x2a0   :  { %700 = shalt.err (!%p697_p7)
}
 0x2a1   :  { %414 = dma.vmem_to_hbm [thread:$0]  %s412_s4, 128, %s1046_s8, [#allocation5]  }
 0x2a2   :  { %s701_s21 = scalar_lea.vmem %s402_s12, 128  ;;  %p706_p9 = scmp.lt.s32.totalorder %s402_s12, %s402_s12 }
 0x2a3   :  { %p702_p8 = scmp.ne.s32.totalorder %s402_s12, %s701_s21  ;;  %p707_p10 = scmp.lt.s32.totalorder %s701_s21, %s701_s21 }
 0x2a5   :  { %p708_p11 = por %p707_p10, %p706_p9 }
 0x2a7   :  { %p709_p12 = pnand %p708_p11, %p702_p8 }
 0x2a9   :  { %712 = shalt.err (!%p709_p12)
}
 0x2aa   :  { %s713_s24 = scalar_lea.hbm %s1045_s7, 128 }
 0x2ab   :  { %p714_p13 = scmp.ne.s32.totalorder %s1045_s7, %s713_s24  ;;  %p717_p0 = scmp.lt.u32.totalorder %s713_s24, %s1045_s7 }
 0x2ad   :  { %p719_p1 = pnand %p717_p0, %p714_p13 }
 0x2af   :  { %722 = shalt.err (!%p719_p1)
}
 0x2b0   :  { %404 = dma.vmem_to_hbm [thread:$0]  %s402_s12, 128, %s1045_s7, [#allocation3]   ;;  %vm391_vm2 = vcmask 31744   ;;  %vm393_vm3 = vcmask 64512  }
 0x2b1   :  { %s754_s3 = smov 4   ;;  %s755_s30 = smov [#allocation6]  }
 0x2b2   :  { %s421_s1 = sshll.u32 %s755_s30, 4  ;;  %s422_s1 = int_to_ptr.vmem [resolvable:$true] %s421_s1 }
 0x2b3   :  { %s723_s10 = scalar_lea.vmem %s422_s1, 128  ;;  %p728_p3 = scmp.lt.s32.totalorder %s422_s1, %s422_s1 }
 0x2b4   :  { %p724_p2 = scmp.ne.s32.totalorder %s422_s1, %s723_s10  ;;  %p729_p4 = scmp.lt.s32.totalorder %s723_s10, %s723_s10 }
 0x2b6   :  { %p730_p5 = por %p729_p4, %p728_p3 }
 0x2b8   :  { %v383_v3 = vpop.f32.mrb[2].mxu0  ;;  %p731_p6 = pnand %p730_p5, %p724_p2 }
 0x2b9   :  { %v599_v26 = vpop.f32.mrb[3].mxu0  ;;  %388 = vrot.lane.b32.xlu0 %v383_v3, %s754_s3 }
 0x32b   :  { %v389_v27 = vpop.permute.xlu0 %388 }
 0x32c   :  { %v392_v28 = vsel %vm391_vm2, %v297_v24, %v389_v27 }
 0x32d   :  { %394 = vst.msk [vmem:[#allocation6] sm:$0xff] %vm393_vm3, %v392_v28 }
 0x32e   :  { %734 = shalt.err (!%p731_p6)
}
 0x32f   :  { %s735_s0 = scalar_lea.hbm %s1047_s9, 128 }
 0x330   :  { %p736_p7 = scmp.ne.s32.totalorder %s1047_s9, %s735_s0  ;;  %p739_p8 = scmp.lt.u32.totalorder %s735_s0, %s1047_s9 }
 0x332   :  { %p741_p9 = pnand %p739_p8, %p736_p7 }
 0x334   :  { %744 = shalt.err (!%p741_p9)
}
 0x335   :  { %424 = dma.vmem_to_hbm [thread:$0]  %s422_s1, 128, %s1047_s9, [#allocation5]  }
 0x336   :  { %745 = dma.done.wait [#allocation3], 128  }
 0x337   :  { %746 = vsyncadd [#allocation3], 4294967168 }
 0x338   :  { %747 = dma.done.wait [#allocation5], 256  }
 0x339   :  { %748 = vsyncadd [#allocation5], 4294967040 }
 0x33a   :  { %434 = vsyncpa [#allocation3], 1 }
 0x33b   :  { %435 = vsyncpa [#allocation5], 1 }

</bundles_post_ra>
